<compile_context>
chip_gen: v7x
topology: tpu7x:2x2x1
jax: 0.10.0
libtpu: 0.0.40
codegen_flags: <defaults>
</compile_context>

<pallas_src>
import functools

import jax
import jax.numpy as jnp
from jax.experimental import pallas as pl
from jax.experimental.pallas import tpu as pltpu


def _round_up(x, m):
    return ((x + m - 1) // m) * m


def _sublane_multiple(dtype):
    # Minimum sublane tile: 8 rows for 4-byte, 16 for 2-byte, 32 for 1-byte dtypes.
    itemsize = jnp.dtype(dtype).itemsize
    return max(8, 32 // max(itemsize, 1))


def _padded_block_bytes(rows, cols, dtype):
    # Honest VMEM footprint of a (rows, cols) block laid out in (sublane, 128) tiles.
    sub = _sublane_multiple(dtype)
    return (_round_up(max(rows, 1), sub)
            * _round_up(max(cols, 1), 128)
            * jnp.dtype(dtype).itemsize)


def _vmem_budget():
    """Return (target x-tile bytes, scoped vmem limit bytes), generation-aware."""
    try:
        info = pltpu.get_tpu_info()
        vmem = getattr(info, "vmem_capacity_bytes", None)
        if vmem is not None and vmem >= 96 * 1024 * 1024:
            # v5e / v6e: 128 MiB physical VMEM -> bigger tiles amortize per-step cost.
            return 8 * 1024 * 1024, 64 * 1024 * 1024
    except Exception:
        pass
    # v7x-safe defaults (64 MiB physical VMEM).
    return 4 * 1024 * 1024, 32 * 1024 * 1024


def _pick_graphs_per_block(num_graphs, npg, C, dtype, target_bytes):
    """Choose bt = graphs per grid step.

    Constraints / preferences:
      * num_graphs % bt == 0 (equal blocks).
      * Legality: when grid > 1 the (bt*npg, C) block rows must be a multiple of
        the dtype sublane tile; bt == num_graphs (full array block) always legal.
      * Padded x-tile footprint <= target_bytes.
      * Prefer grid >= 2 (even step count) so v7x's two TensorCores split the
        work and double-buffering has iterations to overlap.
      * Among remaining candidates, take the largest bt (biggest tile).
    """
    sub = _sublane_multiple(dtype)
    divisors = [d for d in range(1, num_graphs + 1) if num_graphs % d == 0]

    def legal(d):
        return d == num_graphs or (d * npg) % sub == 0

    def fits(d):
        return _padded_block_bytes(d * npg, C, dtype) <= target_bytes

    cands = [d for d in divisors if legal(d) and fits(d)]
    if not cands:
        # No legal tile under the target: take the smallest legal one
        # (num_graphs is always legal) and let the caller raise the VMEM limit.
        return min(d for d in divisors if legal(d))

    multi = [d for d in cands if num_graphs // d >= 2]
    if multi:
        even = [d for d in multi if (num_graphs // d) % 2 == 0]
        pool = even if even else multi
        return max(pool)
    return max(cands)


def get_score_kernel(x_ref, w_ref, xout_ref, score_ref, *, bt, npg):
    # x_ref:     (bt*npg, C)  node features of bt graphs, node-major
    # w_ref:     (1, C)       pre-normalized projection vector p_hat, f32
    # xout_ref:  (bt*npg, C)
    # score_ref: (bt, npg, 1) f32
    x = x_ref[...]
    w = w_ref[...]

    # Projection on the VPU in f32 (exact vs the f32 reference; no MXU rounding,
    # no multi-pass HIGHEST): y_n = sum_c x[n, c] * p_hat[c]  -> (bt*npg, 1)
    s = jnp.sum(x.astype(jnp.float32) * w, axis=-1, keepdims=True)

    # Per-graph mean centering (score.view(B, -1) - mean(1, keepdim=True)), then tanh.
    s3 = s.reshape(bt, npg, 1)
    s3 = s3 - jnp.mean(s3, axis=1, keepdims=True)
    s3 = jnp.tanh(s3)
    # TODO(synk): for small C (< 128) a lane-dense relayout of the scores before
    # tanh (and a lane-folded view of x) would cut EUP/VPU lane waste further;
    # kept in the proven column layout here for lowering robustness.

    score_ref[...] = s3

    # x_out = x * score[:, None]  (broadcast along the channel/lane axis).
    s_col = s3.reshape(bt * npg, 1).astype(x.dtype)
    xout_ref[...] = (x * s_col).astype(xout_ref.dtype)


def get_score(x, weight, num_graphs, *, target_block_bytes=None):
    """x: [N, C] node features; weight: [1, C]; `num_graphs` equal-size graphs.

    Returns (x_out [N, C] in x.dtype, score [num_graphs, N//num_graphs] f32),
    matching Get_score.forward with batch = equal-size graph ids, attn = x,
    min_score = None, multiplier = 1, nonlinearity = tanh.
    """
    N, C = x.shape
    assert N % num_graphs == 0, "score.view(B, -1) requires equal-size graphs"
    # TODO(synk): ragged batches (unequal graph sizes from the `batch` vector) need a
    # BoundedSlice / segment design; this mirrors the PyTorch view(B, -1) assumption.
    npg = N // num_graphs

    target_default, vmem_limit = _vmem_budget()
    if target_block_bytes is None:
        target_block_bytes = target_default

    bt = _pick_graphs_per_block(num_graphs, npg, C, x.dtype, target_block_bytes)
    tn = bt * npg
    grid = (num_graphs // bt,)

    # TODO(synk): a single graph too large for one VMEM block needs a second grid
    # axis over node tiles with the per-graph mean hoisted via scalar prefetch.

    # Honest (padded) VMEM estimate: x in + x_out (double-buffered), score, weight.
    x_tile = _padded_block_bytes(tn, C, x.dtype)
    score_tile = bt * _padded_block_bytes(npg, 1, jnp.float32)
    needed = 2 * 2 * x_tile + 2 * score_tile + _padded_block_bytes(1, C, jnp.float32)
    vmem_limit = max(vmem_limit, _round_up(needed + (1 << 20), 1 << 20))

    # Pre-normalize the projection vector in the wrapper:
    #   tanh((x.p - mean)/||p||) == tanh(x.p_hat - mean(x.p_hat))  (centering is linear)
    wf = weight.reshape(1, C).astype(jnp.float32)
    w_hat = wf / jnp.linalg.norm(wf)

    kernel = functools.partial(get_score_kernel, bt=bt, npg=npg)

    x_out, score = pl.pallas_call(
        kernel,
        out_shape=(
            jax.ShapeDtypeStruct((N, C), x.dtype),
            jax.ShapeDtypeStruct((num_graphs, npg, 1), jnp.float32),
        ),
        grid_spec=pltpu.PrefetchScalarGridSpec(
            num_scalar_prefetch=0,
            grid=grid,
            in_specs=[
                pl.BlockSpec((tn, C), lambda i: (i, 0)),     # bt graphs of nodes
                pl.BlockSpec((1, C), lambda i: (0, 0)),      # shared p_hat
            ],
            out_specs=[
                pl.BlockSpec((tn, C), lambda i: (i, 0)),
                pl.BlockSpec((bt, npg, 1), lambda i: (i, 0, 0)),
            ],
        ),
        compiler_params=pltpu.CompilerParams(
            dimension_semantics=("parallel",),               # megacore-shard graph chunks
            vmem_limit_bytes=int(vmem_limit),
        ),
    )(x, w_hat)

    return x_out, score.reshape(num_graphs, npg)


def get_score_ref(x, weight, num_graphs):
    """Pure-JAX reference mirroring the PyTorch forward (equal-size graphs)."""
    N, C = x.shape
    npg = N // num_graphs
    score = jnp.sum(x * weight, axis=-1)                  # (N,)
    score = score.reshape(num_graphs, npg)
    score = score - jnp.mean(score, axis=1, keepdims=True)
    score = score.reshape(-1)
    score = jnp.tanh(score / jnp.linalg.norm(weight))
    x_out = x * score[:, None]
    return x_out, score.reshape(num_graphs, npg)


if __name__ == "__main__":
    # Small shapes: 2 graphs x 8 nodes each, in_channels = 32.
    B, NPG, C = 2, 8, 32
    N = B * NPG

    key = jax.random.PRNGKey(0)
    kx, kw = jax.random.split(key)

    x = jax.random.normal(kx, (N, C), dtype=jnp.float32)

    # torch_geometric-style uniform init: U(-1/sqrt(C), 1/sqrt(C)).
    bound = 1.0 / jnp.sqrt(jnp.float32(C))
    weight = jax.random.uniform(kw, (1, C), dtype=jnp.float32,
                                minval=-bound, maxval=bound)

    x_out, score = get_score(x, weight, B)
    jax.block_until_ready((x_out, score))

    x_ref, s_ref = get_score_ref(x, weight, B)
    assert jnp.allclose(x_out, x_ref, atol=1e-4, rtol=1e-4)
    assert jnp.allclose(score, s_ref, atol=1e-4, rtol=1e-4)

    print("KERNEL_OK")
</pallas_src>

<mosaic_0001>
module attributes {stable_mosaic.version = 11 : i64} {
  func.func @get_score_kernel(%arg0: i32, %arg1: memref<8x32xf32, #tpu.memory_space<vmem>>, %arg2: memref<1x32xf32, #tpu.memory_space<vmem>>, %arg3: memref<8x32xf32, #tpu.memory_space<vmem>>, %arg4: memref<1x8x1xf32, #tpu.memory_space<vmem>>) attributes {dimension_semantics = [#tpu.dimension_semantics<parallel>], iteration_bounds = array<i64: 2>, scalar_prefetch = 0 : i64, scratch_operands = 0 : i64, tpu.core_type = #tpu.core_type<tc>, window_params = [{transform_indices = @transform_0, window_bounds = array<i64: 8, 32>}, {pipeline_mode = #tpu.pipeline_mode<synchronous>, transform_indices = @transform_1, window_bounds = array<i64: 1, 32>}, {transform_indices = @transform_2, window_bounds = array<i64: 8, 32>}, {transform_indices = @transform_3, window_bounds = array<i64: 1, 8, 1>}]} {
    %c0 = arith.constant 0 : index
    %c0_0 = arith.constant 0 : index
    %0 = vector.load %arg1[%c0, %c0_0] : memref<8x32xf32, #tpu.memory_space<vmem>>, vector<8x32xf32>
    %c0_1 = arith.constant 0 : index
    %c0_2 = arith.constant 0 : index
    %1 = vector.load %arg2[%c0_1, %c0_2] : memref<1x32xf32, #tpu.memory_space<vmem>>, vector<1x32xf32>
    %2 = vector.broadcast %1 : vector<1x32xf32> to vector<8x32xf32>
    %3 = arith.mulf %0, %2 : vector<8x32xf32>
    %cst = arith.constant dense<0.000000e+00> : vector<8xf32>
    %4 = vector.multi_reduction <add>, %3, %cst [1] : vector<8x32xf32> to vector<8xf32>
    %5 = vector.shape_cast %4 : vector<8xf32> to vector<8x1xf32>
    %6 = vector.shape_cast %5 : vector<8x1xf32> to vector<1x8x1xf32>
    %cst_3 = arith.constant dense<0.000000e+00> : vector<1x1xf32>
    %7 = vector.multi_reduction <add>, %6, %cst_3 [1] : vector<1x8x1xf32> to vector<1x1xf32>
    %8 = vector.shape_cast %7 : vector<1x1xf32> to vector<1x1x1xf32>
    %cst_4 = arith.constant 8.000000e+00 : f32
    %9 = vector.broadcast %cst_4 : f32 to vector<1x1x1xf32>
    %10 = arith.divf %8, %9 : vector<1x1x1xf32>
    %11 = vector.broadcast %10 : vector<1x1x1xf32> to vector<1x8x1xf32>
    %12 = arith.subf %6, %11 : vector<1x8x1xf32>
    %13 = math.tanh %12 : vector<1x8x1xf32>
    %c0_5 = arith.constant 0 : index
    %c0_6 = arith.constant 0 : index
    %c0_7 = arith.constant 0 : index
    %14 = vector.load %arg4[%c0_5, %c0_6, %c0_7] : memref<1x8x1xf32, #tpu.memory_space<vmem>>, vector<1x8x1xf32>
    tpu.vector_store %arg4[%c0_5, %c0_6, %c0_7], %13 {strides = array<i32>} : memref<1x8x1xf32, #tpu.memory_space<vmem>>, vector<1x8x1xf32>,
    %15 = vector.shape_cast %13 : vector<1x8x1xf32> to vector<8x1xf32>
    %16 = vector.broadcast %15 : vector<8x1xf32> to vector<8x32xf32>
    %17 = arith.mulf %0, %16 : vector<8x32xf32>
    %c0_8 = arith.constant 0 : index
    %c0_9 = arith.constant 0 : index
    %18 = vector.load %arg3[%c0_8, %c0_9] : memref<8x32xf32, #tpu.memory_space<vmem>>, vector<8x32xf32>
    tpu.vector_store %arg3[%c0_8, %c0_9], %17 {strides = array<i32>} : memref<8x32xf32, #tpu.memory_space<vmem>>, vector<8x32xf32>,
    return
  }
  func.func @transform_0(%arg0: i32) -> (i32, i32) {
    %c0_i32 = arith.constant 0 : i32
    %c0_i32_0 = arith.constant 0 : i32
    return %arg0, %c0_i32 : i32, i32
  }
  func.func @transform_1(%arg0: i32) -> (i32, i32) {
    %c0_i32 = arith.constant 0 : i32
    %c0_i32_0 = arith.constant 0 : i32
    %c0_i32_1 = arith.constant 0 : i32
    return %c0_i32, %c0_i32_0 : i32, i32
  }
  func.func @transform_2(%arg0: i32) -> (i32, i32) {
    %c0_i32 = arith.constant 0 : i32
    %c0_i32_0 = arith.constant 0 : i32
    return %arg0, %c0_i32 : i32, i32
  }
  func.func @transform_3(%arg0: i32) -> (i32, i32, i32) {
    %c0_i32 = arith.constant 0 : i32
    %c0_i32_0 = arith.constant 0 : i32
    %c0_i32_1 = arith.constant 0 : i32
    return %arg0, %c0_i32, %c0_i32_0 : i32, i32, i32
  }
}

</mosaic_0001>

<bundles_post_ra>
// kernel: tpu_custom_call.1
= control target key start
LH: loop header
LB: loop body
LE: loop exit
PB: predicated region body
PF: predicated region fallthrough
CT: control target
= control target key end

     0   :  { %9 = vsyncpa [#allocation3], 0  ;;  %s692_s0 = inlined_call_operand.hbm [shape: f32[16,32], index: 0, kind: input, shape index: {}]   ;;  %s693_s1 = inlined_call_operand.vmem [shape: f32[1,32], index: 1, kind: input, shape index: {}]   ;;  %s694_s2 = inlined_call_operand.hbm [shape: f32[16,32], index: 2, kind: output, shape index: {0}]   ;;  %s695_s3 = inlined_call_operand.vmem [shape: f32[2,8,1], index: 3, kind: output, shape index: {1}]  }
   0x1   :  { %11 = vsyncpa [#allocation3 + $0x1], 0 }
   0x2   :  { %12 = vsyncpa [#allocation4], 0 }
   0x3   :  { %14 = vsyncpa [#allocation4 + $0x1], 0  ;;  %s521_s12 = smov 0   ;;  %s523_s13 = smov 0  }
   0x4   :  { %s525_s14 = smov 0   ;;  %s527_s15 = smov 0  }
   0x5 LB: > { %s542_s16 = sadd.s32 4294967295, %s497_s15   ;;  %s339_s17 = sadd.s32 4294967294, %s497_s15   ;;  %s497_s15 = sphi %s527_s15, %s710_s15   ;;  %s493_s14 = sphi %s525_s14, %s709_s14   ;;  %s489_s13 = sphi %s523_s13, %s708_s13   ;;  %s485_s12 = sphi %s521_s12, %s707_s12  }
   0x6   : > { %s546_s18 = sadd.s32 1, %s497_s15   ;;  %s27_s19 = sadd.s32 1, %s493_s14 }
   0x7   : > { %s24_s20 = ssub.s32 %s497_s15, %s546_s18  ;;  %p34_p0 = scmp.ne.s32.totalorder %s493_s14, %s489_s13 }
   0x8   : > { %p25_p1 = scmp.eq.s32.totalorder %s24_s20, 0  ;;  %p35_p2 = scmp.eq.s32.totalorder %s497_s15, 0 }
   0x9   : > { %p40_p3 = scmp.ne.s32.totalorder %s489_s13, %s485_s12  ;;  %p41_p4 = scmp.eq.s32.totalorder %s542_s16, 0 }
   0xa   : > { %s558_s21 = scalar_select %p25_p1, %s493_s14, %s27_s19  }
   0xb   : > { %p560_p5 = por %p35_p2, %p34_p0  ;;  %p564_p6 = por %p41_p4, %p40_p3 }
   0xc   : > { %p85_p7 = scmp.eq.s32.totalorder %s542_s16, 1  ;;  %p91_p8 = scmp.eq.s32.totalorder %s339_s17, 1 }
   0xd   : > { %p365_p10 = scmp.lt.s32.totalorder %s497_s15, 2  ;;  %s140_s26 = sand.u32 1, %s493_s14  }
   0xe   : > { %p571_p11 = por %p85_p7, %p34_p0  ;;  %p575_p12 = por %p91_p8, %p40_p3 }
   0xf   : > { %s343_s27 = sshll.u32 %s497_s15, 7  ;;  %s342_s28 = sshll.u32 %s140_s26, 3 }
  0x10   : > { %s699_s24 = scalar_select %p571_p11, 1, 0 }
  0x11   : > { %s700_s25 = scalar_select %p575_p12, 1, 0 }
  0x12   : > { %s584_s4 = scalar_lea.hbm %s692_s0, %s343_s27  ;;  %s144_s5 = scalar_lea.vmem [#allocation2], %s342_s28 }
  0x13   : > { %s151_s6 = sshll.u32 %s144_s5, 4  ;;  %p588_p13 = pnand %p365_p10, %p560_p5  ;;  %s592_s6 = int_to_ptr.vmem [resolvable:$true] %s151_s6 }
  0x14   : > { %s141_s8 = scalar_lea.sflag [#allocation3], %s140_s26  ;;  %s401_s9 = scalar_lea.hbm %s584_s4, 128 }
  0x15   : > { %p402_p2 = scmp.ne.s32.totalorder %s584_s4, %s401_s9  ;;  %p403_p3 = pneg %p588_p13 }
  0x16   : > { %s406_s17 = scalar_lea.hbm %s692_s0, 256  ;;  %p407_p5 = scmp.lt.u32.totalorder %s584_s4, %s692_s0 }
  0x17   : > { %p404_p4 = pnand %p403_p3, %p402_p2  ;;  %p408_p8 = scmp.lt.u32.totalorder %s406_s17, %s401_s9 }
  0x18   : > { %p410_p9 = scmp.lt.u32.totalorder %s401_s9, %s584_s4 }
  0x19   : > { %p405_p7 = pneg %p404_p4  ;;  %p409_p10 = por %p408_p8, %p407_p5 }
  0x1b   : > { %p411_p0 = por %p410_p9, %p409_p10 }
  0x1d   : > { %p412_p1 = pnand %p411_p0, %p405_p7 }
  0x1f   : > { %415 = shalt.err (!%p412_p1)
}
  0x20   : > { %s416_s22 = scalar_lea.vmem %s592_s6, 128  ;;  %s499_s26 = smov [#allocation2]  }
  0x21   : > { %p417_p2 = scmp.ne.s32.totalorder %s592_s6, %s416_s22  ;;  %s421_s27 = sshll.u32 %s499_s26, 4  ;;  %s422_s27 = int_to_ptr.vmem [resolvable:$false] %s421_s27 }
  0x22   : > { %s423_s28 = scalar_lea.vmem %s422_s27, 256  ;;  %p424_p11 = scmp.lt.s32.totalorder %s592_s6, %s422_s27 }
  0x23   : > { %p419_p4 = pnand %p417_p2, %p403_p3  ;;  %p425_p5 = scmp.lt.s32.totalorder %s423_s28, %s416_s22 }
  0x25   : > { %p420_p12 = pneg %p419_p4  ;;  %p426_p8 = por %p425_p5, %p424_p11 }
  0x27   : > { %p427_p9 = pnand %p426_p8, %p420_p12 }
  0x29   : > { %430 = shalt.err (!%p427_p9)
}
  0x2a   : > { %360 = dma.hbm_to_vmem [thread:$0]  (!%p588_p13), %s584_s4, 128, %s592_s6, %s141_s8  }
  0x2b   : > { %p702_p0 = scmp.lt.s32.totalorder %s497_s15, 3  ;;  %p703_p1 = scmp.ge.s32.totalorder %s497_s15, 1 }
  0x2d   : > { %p157_p3 = pnand %p703_p1, %p702_p0 }
  0x2e   : > { %s626_s29 = sand.u32 (!%p157_p3), 1, %s489_s13  }
  0x2f   : > { %160 = sbr.rel (%p157_p3) target bundleno = 244 (0xf4), region = 28  ;;  %s345_s30 = sshll.u32 (!%p157_p3), %s626_s29, 3 }
  0x30   : > { %s163_s5 = scalar_lea.sflag (!%p157_p3), [#allocation3], %s626_s29  ;;  %s166_s9 = scalar_lea.vmem (!%p157_p3), [#allocation2], %s345_s30 }
  0x36   : > { %476 = dma.done.wait (%p564_p6), %s163_s5, 128  }
  0x37   : > { %478 = vsyncadd (%p564_p6), %s163_s5, 4294967168  ;;  %v197_v0 = vld [vmem:[%s166_s9] sm:$0xff]  ;;  %v348_v1 = vld [vmem:[%s693_s1] ss:$0 sm:$0xff]  ;;  %vm206_vm0 = vcmask 261120   ;;  %p193_p6 = scmp.lt.s32.totalorder %s542_s16, 1 }
  0x38   : > { %v205_v2 = vmul.f32 %v348_v1, %v197_v0  ;;  %vm220_vm1 = vcmask 7168   ;;  %s350_s17 = sshll.u32 %s542_s16, 7  ;;  %s186_s19 = scalar_lea.vmem [#allocation5], %s345_s30 }
  0x39   : > { %s194_s23 = scalar_select %p193_p6, %s542_s16, 1 }
  0x3a   : > { %v207_v3 = vsel %vm206_vm0, %v205_v2, 0.0  ;;  %s242_s20 = sshll.u32 %s186_s19, 4  ;;  %s647_s27 = scalar_lea.hbm %s694_s2, %s350_s17  ;;  %s649_s20 = int_to_ptr.vmem [resolvable:$true] %s242_s20 }
  0x3b   : > { %208 = vadd.xlane.f32.xlu0 %v207_v3  ;;  %s347_s7 = sshll.u32 %s194_s23, 3  ;;  %s225_s28 = scalar_lea.sflag [#allocation4], %s626_s29 }
  0x3c   : > { %s196_s11 = scalar_lea.vmem %s695_s3, %s347_s7  ;;  %s431_s5 = scalar_lea.vmem %s649_s20, 128 }
  0x3d   : > { %p432_p11 = scmp.ne.s32.totalorder %s649_s20, %s431_s5  ;;  %p704_p12 = scmp.ne.s32.totalorder %s699_s24, 0 }
  0x3e   : > { %s500_s16 = smov [#allocation5]  }
  0x3f   : > { %p433_p13 = pnand %p432_p11, %p704_p12  ;;  %s435_s30 = sshll.u32 %s500_s16, 4  ;;  %s436_s30 = int_to_ptr.vmem [resolvable:$false] %s435_s30 }
  0x40   : > { %s437_s9 = scalar_lea.vmem %s436_s30, 256  ;;  %p438_p10 = scmp.lt.s32.totalorder %s649_s20, %s436_s30 }
  0x41   : > { %p434_p7 = pneg %p433_p13  ;;  %p439_p2 = scmp.lt.s32.totalorder %s437_s9, %s431_s5 }
  0x43   : > { %p440_p4 = por %p439_p2, %p438_p10 }
  0x45   : > { %p441_p5 = pnand %p440_p4, %p434_p7 }
  0xc8   : > { %v209_v4 = vpop.xlane.xlu0 %208 }
  0xc9   : > { %v210_v5 = vrot.slane %v209_v4, 4 }
  0xcb   : > { %v211_v6 = vadd.f32 %v210_v5, %v209_v4 }
  0xcd   : > { %v212_v7 = vrot.slane %v211_v6, 2 }
  0xcf   : > { %v213_v8 = vadd.f32 %v212_v7, %v211_v6 }
  0xd1   : > { %v214_v9 = vrot.slane %v213_v8, 1 }
  0xd3   : > { %v215_v10 = vadd.f32 %v214_v9, %v213_v8 }
  0xd5   : > { %v217_v11 = vmul.f32 0.125, %v215_v10 }
  0xd7   : > { %v218_v12 = vsub.f32 %v209_v4, %v217_v11 }
  0xd9   : > { %399 = vtanh.f32 %v218_v12 }
  0xe3   : > { %v400_v13 = vpop.eup %399 }
  0xe4   : > { %221 = vst.msk [vmem:[%s196_s11] sm:$0xff] %vm220_vm1, %v400_v13  ;;  %v222_v14 = vmul.f32 %v400_v13, %v197_v0 }
  0xe6   : > { %223 = vst.msk [vmem:[%s186_s19] sm:$0xff] %vm206_vm0, %v222_v14 }
  0xe7   : > { %444 = shalt.err (!%p441_p5)
}
  0xe8   : > { %s445_s29 = scalar_lea.hbm %s647_s27, 128  ;;  %s449_s23 = scalar_lea.hbm %s694_s2, 256 }
  0xe9   : > { %p446_p8 = scmp.ne.s32.totalorder %s647_s27, %s445_s29  ;;  %p450_p1 = scmp.lt.u32.totalorder %s647_s27, %s694_s2 }
  0xea   : > { %p451_p3 = scmp.lt.u32.totalorder %s449_s23, %s445_s29  ;;  %p453_p11 = scmp.lt.u32.totalorder %s445_s29, %s647_s27 }
  0xeb   : > { %p447_p9 = pnand %p446_p8, %p704_p12 }
  0xec   : > { %p452_p6 = por %p451_p3, %p450_p1 }
  0xed   : > { %p448_p0 = pneg %p447_p9 }
  0xee   : > { %p454_p13 = por %p453_p11, %p452_p6 }
  0xf0   : > { %p455_p7 = pnand %p454_p13, %p448_p0 }
  0xf2   : > { %458 = shalt.err (!%p455_p7)
}
  0xf3   : > { %355 = dma.vmem_to_hbm [thread:$0]  (%p704_p12), %s649_s20, 128, %s647_s27, %s225_s28  }
  0xf4 PF: > { %s257_s10 = sand.u32 1, %s485_s12   ;;  %p705_p10 = scmp.ne.s32.totalorder %s700_s25, 0 }
  0xf5   : > { %p706_p2 = scmp.ge.s32.totalorder %s497_s15, 2  ;;  %s258_s11 = scalar_lea.sflag [#allocation4], %s257_s10 }
  0xf7   : > { %p362_p4 = pnand %p706_p2, %p705_p10 }
  0xf9   : > { %480 = dma.done.wait (!%p362_p4), %s258_s11, 128  }
  0xfa   : > { %482 = vsyncadd (!%p362_p4), %s258_s11, 4294967168  ;;  %p17_p5 = scmp.ge.s32.totalorder %s546_s18, 4   ;;  %s707_s12 = smov %s489_s13 }
  0xfb   : > { %s708_s13 = smov %s493_s14  ;;  %s709_s14 = smov %s558_s21 }
  0xfc   : > { %s710_s15 = smov %s546_s18  ;;  %19 = sbr.rel (!%p17_p5) target bundleno = 5 (0x5), region = 85 }
 0x103   :  { %270 = vsyncpa [#allocation3], 1 }
 0x104   :  { %272 = vsyncpa [#allocation3 + $0x1], 1 }
 0x105   :  { %273 = vsyncpa [#allocation4], 1 }
 0x106   :  { %275 = vsyncpa [#allocation4 + $0x1], 1 }

</bundles_post_ra>
